<compile_context>
chip_gen: v7x
topology: tpu7x:2x2x1
jax: 0.10.0
libtpu: 0.0.40
codegen_flags: <defaults>
</compile_context>

<pallas_src>
import functools

import jax
import jax.numpy as jnp
from jax.experimental import pallas as pl
from jax.experimental.pallas import tpu as pltpu


def _cdiv(a, b):
    return -(-a // b)


def _round_up(a, b):
    return _cdiv(a, b) * b


def _device_kind():
    try:
        return jax.devices()[0].device_kind.lower()
    except Exception:
        return ""


def _vmem_capacity_bytes():
    try:
        return int(pltpu.get_tpu_info().vmem_capacity_bytes)
    except Exception:
        pass
    # Fallback from the device kind: v7x has 64 MiB per TC, v5e/v6e have 128 MiB.
    return 64 * 1024 * 1024 if "v7" in _device_kind() else 128 * 1024 * 1024


def _pick_block_k(H, max_bk=512):
    """Largest multiple-of-128 divisor of H that is <= max_bk, else H itself."""
    if H <= max_bk or H % 128 != 0:
        return H
    for bk in range(max_bk, 0, -128):
        if H % bk == 0:
            return bk
    return H


def _hybrid_head_kernel(x_ref, w_ref, b_ref, gmask_ref,
                        euc_ref, hyp_ref, prj_ref, dq_ref,
                        acc_ref, *, D, D2):
    k = pl.program_id(1)

    @pl.when(k == 0)
    def _():
        acc_ref[...] = jnp.zeros_like(acc_ref)

    # Streamed fused matmul; accumulator columns are
    #   [ euclidean(D) | hyperbolic(D) | projective(D) | real(D2) | dual(D2) ]
    acc_ref[...] += jnp.dot(x_ref[...], w_ref[...],
                            preferred_element_type=jnp.float32)

    @pl.when(k == pl.num_programs(1) - 1)
    def _():
        y = acc_ref[...] + b_ref[...]

        euc = y[:, :D]
        hyp = y[:, D:2 * D]
        prj = y[:, 2 * D:3 * D]
        real = y[:, 3 * D:3 * D + D2]
        dual = y[:, 3 * D + D2:]

        # euclidean: pass-through, direct store (no repacking / concatenate).
        euc_ref[...] = euc

        # hyperbolic: x / (1 + ||x||)
        hnorm = jnp.sqrt(jnp.sum(hyp * hyp, axis=-1, keepdims=True))
        hyp_ref[...] = hyp * pl.reciprocal(1.0 + hnorm)

        # projective: x / (||x|| + 1e-8)
        pnorm = jnp.sqrt(jnp.sum(prj * prj, axis=-1, keepdims=True))
        prj_ref[...] = prj * pl.reciprocal(pnorm + 1e-8)

        # dual quaternion: normalize the real part per contiguous group of 4.
        # gmask is a block-diagonal (D2, D2) group mask: one matmul both reduces
        # within each quaternion and broadcasts the group sum back to its 4 lanes.
        gsum = jnp.dot(real * real, gmask_ref[...],
                       preferred_element_type=jnp.float32)
        real_n = real * pl.reciprocal(jnp.sqrt(gsum) + 1e-8)
        dq_ref[:, :D2] = real_n
        dq_ref[:, D2:] = dual


def prepare_params(params):
    """One-time fusion of the five Linears (do NOT redo this on every forward)."""
    w_all = jnp.concatenate(
        [params["w_euc"], params["w_hyp"], params["w_prj"],
         params["w_real"], params["w_dual"]], axis=1)
    b_all = jnp.concatenate(
        [params["b_euc"], params["b_hyp"], params["b_prj"],
         params["b_real"], params["b_dual"]], axis=1)
    D = params["w_euc"].shape[1]
    D2 = D // 2
    idx = jnp.arange(D2)
    gmask = (idx[:, None] // 4 == idx[None, :] // 4).astype(jnp.float32)
    return {"w_all": w_all, "b_all": b_all, "gmask": gmask}


def hybrid_head_forward(x, fused, *, block_b=None, max_block_k=512):
    """Fused HybridHead forward.  x: (B, H) float32; `fused` from prepare_params."""
    B, H = x.shape
    N = fused["w_all"].shape[1]          # == 4 * D
    D = N // 4
    D2 = D // 2

    if block_b is None:
        # v5e: 4x128x128 MXU + lower HBM BW -> 128-row M tiles pipeline better.
        block_b = 128 if "v5" in _device_kind() else 256

    # ---- batch tiling: multiple-of-8 tiles; force >= 2 tiles when possible so both
    # v7x TensorCores get work under dimension_semantics=("parallel", ...).
    n_rows = _round_up(B, 8)
    n_tiles = max(1, _cdiv(n_rows, block_b))
    if n_tiles < 2 and n_rows >= 16:
        n_tiles = 2
    block_b = _round_up(_cdiv(n_rows, n_tiles), 8)
    B_pad = block_b * n_tiles
    if B_pad != B:
        x = jnp.pad(x, ((0, B_pad - B), (0, 0)))

    # ---- hidden (K) streaming: weight read in (block_k, N) chunks, double-buffered.
    block_k = _pick_block_k(H, max_block_k)
    n_k = H // block_k
    grid = (n_tiles, n_k)

    x_spec = pl.BlockSpec((block_b, block_k), lambda i, k: (i, k))
    w_spec = pl.BlockSpec((block_k, N), lambda i, k: (k, 0))
    b_spec = pl.BlockSpec((1, N), lambda i, k: (0, 0))
    g_spec = pl.BlockSpec((D2, D2), lambda i, k: (0, 0))
    head_spec = pl.BlockSpec((block_b, D), lambda i, k: (i, 0))

    # ---- generation-aware VMEM budget (no hard 64 MiB cap on v5e/v6e).
    needed = 4 * (2 * block_b * block_k          # x tile (double-buffered)
                  + 2 * block_k * N              # streamed weight chunk (double-buffered)
                  + 2 * (N + D2 * D2)            # bias + group mask
                  + block_b * N                  # f32 accumulator scratch
                  + 2 * 4 * block_b * D)         # four outputs (double-buffered)
    budget = max(_vmem_capacity_bytes() - 20 * 1024 * 1024, 32 * 1024 * 1024)
    vmem_limit = int(max(32 * 1024 * 1024,
                         min(2 * needed + 16 * 1024 * 1024, budget)))

    cost = pl.CostEstimate(
        flops=2 * B_pad * H * N + 2 * B_pad * D2 * D2,
        transcendentals=B_pad * (D2 + 4),
        bytes_accessed=4 * (B_pad * H + n_tiles * H * N + N + D2 * D2 + B_pad * N),
    )

    out_shape = tuple(jax.ShapeDtypeStruct((B_pad, D), jnp.float32) for _ in range(4))

    euc, hyp, prj, dq = pl.pallas_call(
        functools.partial(_hybrid_head_kernel, D=D, D2=D2),
        out_shape=out_shape,
        grid_spec=pltpu.PrefetchScalarGridSpec(
            num_scalar_prefetch=0,
            grid=grid,
            in_specs=[x_spec, w_spec, b_spec, g_spec],
            out_specs=[head_spec, head_spec, head_spec, head_spec],
            scratch_shapes=[pltpu.VMEM((block_b, N), jnp.float32)],
        ),
        compiler_params=pltpu.CompilerParams(
            dimension_semantics=("parallel", "arbitrary"),
            vmem_limit_bytes=vmem_limit,
        ),
        cost_estimate=cost,
    )(x, fused["w_all"], fused["b_all"], fused["gmask"])

    return {
        "euclidean": euc[:B],
        "hyperbolic": hyp[:B],
        "projective": prj[:B],
        "dual_quaternion": dq[:B],
    }


def init_params(key, hidden_dim, output_dim):
    """Deterministic nn.Linear-style init.  Weights are (in, out); biases (1, out)."""
    assert output_dim % 8 == 0
    d2 = output_dim // 2
    ks = jax.random.split(key, 10)
    bound = 1.0 / (hidden_dim ** 0.5)

    def lin(kw, kb, out_dim):
        w = jax.random.uniform(kw, (hidden_dim, out_dim), jnp.float32, -bound, bound)
        b = jax.random.uniform(kb, (1, out_dim), jnp.float32, -bound, bound)
        return w, b

    w_euc, b_euc = lin(ks[0], ks[1], output_dim)
    w_hyp, b_hyp = lin(ks[2], ks[3], output_dim)
    w_prj, b_prj = lin(ks[4], ks[5], output_dim)
    w_real, b_real = lin(ks[6], ks[7], d2)
    w_dual, b_dual = lin(ks[8], ks[9], d2)
    return dict(
        w_euc=w_euc, b_euc=b_euc,
        w_hyp=w_hyp, b_hyp=b_hyp,
        w_prj=w_prj, b_prj=b_prj,
        w_real=w_real, b_real=b_real,
        w_dual=w_dual, b_dual=b_dual,
    )


def ref_forward(x, params):
    """Pure-JAX reference mirroring the PyTorch forward."""
    euc = x @ params["w_euc"] + params["b_euc"][0]

    hyp = x @ params["w_hyp"] + params["b_hyp"][0]
    hyp = hyp / (1.0 + jnp.linalg.norm(hyp, axis=-1, keepdims=True))

    prj = x @ params["w_prj"] + params["b_prj"][0]
    prj = prj / (jnp.linalg.norm(prj, axis=-1, keepdims=True) + 1e-8)

    real = x @ params["w_real"] + params["b_real"][0]
    dual = x @ params["w_dual"] + params["b_dual"][0]
    d2 = real.shape[-1]
    r = real.reshape(-1, d2 // 4, 4)
    rn = jnp.linalg.norm(r, axis=-1, keepdims=True)
    r = (r / (rn + 1e-8)).reshape(-1, d2)  # equals the literal PyTorch code when d2 == 4
    dq = jnp.concatenate([r, dual], axis=-1)

    return {
        "euclidean": euc,
        "hyperbolic": hyp,
        "projective": prj,
        "dual_quaternion": dq,
    }


if __name__ == "__main__":
    BATCH, HIDDEN, OUT = 16, 32, 8   # OUT=8 keeps the literal PyTorch reshape valid
    key = jax.random.PRNGKey(0)
    kx, kp = jax.random.split(key)

    x = jax.random.normal(kx, (BATCH, HIDDEN), dtype=jnp.float32)
    params = init_params(kp, HIDDEN, OUT)
    fused = prepare_params(params)          # one-time weight/bias/gmask fusion

    fwd = jax.jit(hybrid_head_forward)
    out = jax.block_until_ready(fwd(x, fused))

    ref = ref_forward(x, params)
    for name in ("euclidean", "hyperbolic", "projective", "dual_quaternion"):
        assert out[name].shape == (BATCH, OUT), (name, out[name].shape)
        assert out[name].dtype == jnp.float32
        assert jnp.allclose(out[name], ref[name], atol=1e-5, rtol=1e-5), name

    print("KERNEL_OK")
</pallas_src>

<mosaic_0001>
module attributes {stable_mosaic.version = 11 : i64} {
  func.func @_hybrid_head_kernel(%arg0: i32, %arg1: i32, %arg2: memref<8x32xf32, #tpu.memory_space<vmem>>, %arg3: memref<32x32xf32, #tpu.memory_space<vmem>>, %arg4: memref<1x32xf32, #tpu.memory_space<vmem>>, %arg5: memref<4x4xf32, #tpu.memory_space<vmem>>, %arg6: memref<8x8xf32, #tpu.memory_space<vmem>>, %arg7: memref<8x8xf32, #tpu.memory_space<vmem>>, %arg8: memref<8x8xf32, #tpu.memory_space<vmem>>, %arg9: memref<8x8xf32, #tpu.memory_space<vmem>>, %arg10: memref<8x32xf32, #tpu.memory_space<vmem>>) attributes {dimension_semantics = [#tpu.dimension_semantics<parallel>, #tpu.dimension_semantics<arbitrary>], iteration_bounds = array<i64: 2, 1>, scalar_prefetch = 0 : i64, scratch_operands = 1 : i64, tpu.core_type = #tpu.core_type<tc>, window_params = [{transform_indices = @transform_0, window_bounds = array<i64: 8, 32>}, {transform_indices = @transform_1, window_bounds = array<i64: 32, 32>}, {pipeline_mode = #tpu.pipeline_mode<synchronous>, transform_indices = @transform_2, window_bounds = array<i64: 1, 32>}, {pipeline_mode = #tpu.pipeline_mode<synchronous>, transform_indices = @transform_3, window_bounds = array<i64: 4, 4>}, {transform_indices = @transform_4, window_bounds = array<i64: 8, 8>}, {transform_indices = @transform_5, window_bounds = array<i64: 8, 8>}, {transform_indices = @transform_6, window_bounds = array<i64: 8, 8>}, {transform_indices = @transform_7, window_bounds = array<i64: 8, 8>}]} {
    %c0_i32 = arith.constant 0 : i32
    %0 = arith.cmpi eq, %arg1, %c0_i32 : i32
    %1 = arith.extui %0 : i1 to i32
    %c0_i32_0 = arith.constant 0 : i32
    %2 = arith.cmpi ne, %1, %c0_i32_0 : i32
    scf.if %2 {
      %cst_10 = arith.constant 0.000000e+00 : f32
      %12 = vector.broadcast %cst_10 : f32 to vector<8x32xf32>
      %c0_11 = arith.constant 0 : index
      %c0_12 = arith.constant 0 : index
      %13 = vector.load %arg10[%c0_11, %c0_12] : memref<8x32xf32, #tpu.memory_space<vmem>>, vector<8x32xf32>
      tpu.vector_store %arg10[%c0_11, %c0_12], %12 {strides = array<i32>} : memref<8x32xf32, #tpu.memory_space<vmem>>, vector<8x32xf32>,
    } else {
    }
    %c0 = arith.constant 0 : index
    %c0_1 = arith.constant 0 : index
    %3 = vector.load %arg10[%c0, %c0_1] : memref<8x32xf32, #tpu.memory_space<vmem>>, vector<8x32xf32>
    %c0_2 = arith.constant 0 : index
    %c0_3 = arith.constant 0 : index
    %4 = vector.load %arg2[%c0_2, %c0_3] : memref<8x32xf32, #tpu.memory_space<vmem>>, vector<8x32xf32>
    %c0_4 = arith.constant 0 : index
    %c0_5 = arith.constant 0 : index
    %5 = vector.load %arg3[%c0_4, %c0_5] : memref<32x32xf32, #tpu.memory_space<vmem>>, vector<32x32xf32>
    %cst = arith.constant dense<0.000000e+00> : vector<8x32xf32>
    %6 = tpu.matmul %4, %5, %cst {dimension_numbers = #tpu.dot_dimension_numbers<[1], [0], [0], [1], [0, 0, 1, 1], [], []>} : vector<8x32xf32>, vector<32x32xf32>, vector<8x32xf32> -> vector<8x32xf32>
    %7 = arith.addf %3, %6 : vector<8x32xf32>
    %c0_6 = arith.constant 0 : index
    %c0_7 = arith.constant 0 : index
    %8 = vector.load %arg10[%c0_6, %c0_7] : memref<8x32xf32, #tpu.memory_space<vmem>>, vector<8x32xf32>
    tpu.vector_store %arg10[%c0_6, %c0_7], %7 {strides = array<i32>} : memref<8x32xf32, #tpu.memory_space<vmem>>, vector<8x32xf32>,
    %c0_i32_8 = arith.constant 0 : i32
    %9 = arith.cmpi eq, %arg1, %c0_i32_8 : i32
    %10 = arith.extui %9 : i1 to i32
    %c0_i32_9 = arith.constant 0 : i32
    %11 = arith.cmpi ne, %10, %c0_i32_9 : i32
    scf.if %11 {
      %c0_10 = arith.constant 0 : index
      %c0_11 = arith.constant 0 : index
      %12 = vector.load %arg10[%c0_10, %c0_11] : memref<8x32xf32, #tpu.memory_space<vmem>>, vector<8x32xf32>
      %c0_12 = arith.constant 0 : index
      %c0_13 = arith.constant 0 : index
      %13 = vector.load %arg4[%c0_12, %c0_13] : memref<1x32xf32, #tpu.memory_space<vmem>>, vector<1x32xf32>
      %14 = vector.broadcast %13 : vector<1x32xf32> to vector<8x32xf32>
      %15 = arith.addf %12, %14 : vector<8x32xf32>
      %16 = vector.extract_strided_slice %15 {offsets = [0, 0], sizes = [8, 8], strides = [1, 1]} : vector<8x32xf32> to vector<8x8xf32>
      %17 = vector.extract_strided_slice %15 {offsets = [0, 8], sizes = [8, 8], strides = [1, 1]} : vector<8x32xf32> to vector<8x8xf32>
      %18 = vector.extract_strided_slice %15 {offsets = [0, 16], sizes = [8, 8], strides = [1, 1]} : vector<8x32xf32> to vector<8x8xf32>
      %19 = vector.extract_strided_slice %15 {offsets = [0, 24], sizes = [8, 4], strides = [1, 1]} : vector<8x32xf32> to vector<8x4xf32>
      %20 = vector.extract_strided_slice %15 {offsets = [0, 28], sizes = [8, 4], strides = [1, 1]} : vector<8x32xf32> to vector<8x4xf32>
      %c0_14 = arith.constant 0 : index
      %c0_15 = arith.constant 0 : index
      %21 = vector.load %arg6[%c0_14, %c0_15] : memref<8x8xf32, #tpu.memory_space<vmem>>, vector<8x8xf32>
      tpu.vector_store %arg6[%c0_14, %c0_15], %16 {strides = array<i32>} : memref<8x8xf32, #tpu.memory_space<vmem>>, vector<8x8xf32>,
      %22 = arith.mulf %17, %17 : vector<8x8xf32>
      %cst_16 = arith.constant dense<0.000000e+00> : vector<8xf32>
      %23 = vector.multi_reduction <add>, %22, %cst_16 [1] : vector<8x8xf32> to vector<8xf32>
      %24 = vector.shape_cast %23 : vector<8xf32> to vector<8x1xf32>
      %25 = math.sqrt %24 : vector<8x1xf32>
      %cst_17 = arith.constant 1.000000e+00 : f32
      %26 = vector.broadcast %cst_17 : f32 to vector<8x1xf32>
      %27 = arith.addf %26, %25 : vector<8x1xf32>
      %28 = tpu.reciprocal %27 : vector<8x1xf32> -> vector<8x1xf32>
      %29 = vector.broadcast %28 : vector<8x1xf32> to vector<8x8xf32>
      %30 = arith.mulf %17, %29 : vector<8x8xf32>
      %c0_18 = arith.constant 0 : index
      %c0_19 = arith.constant 0 : index
      %31 = vector.load %arg7[%c0_18, %c0_19] : memref<8x8xf32, #tpu.memory_space<vmem>>, vector<8x8xf32>
      tpu.vector_store %arg7[%c0_18, %c0_19], %30 {strides = array<i32>} : memref<8x8xf32, #tpu.memory_space<vmem>>, vector<8x8xf32>,
      %32 = arith.mulf %18, %18 : vector<8x8xf32>
      %cst_20 = arith.constant dense<0.000000e+00> : vector<8xf32>
      %33 = vector.multi_reduction <add>, %32, %cst_20 [1] : vector<8x8xf32> to vector<8xf32>
      %34 = vector.shape_cast %33 : vector<8xf32> to vector<8x1xf32>
      %35 = math.sqrt %34 : vector<8x1xf32>
      %cst_21 = arith.constant 9.99999993E-9 : f32
      %36 = vector.broadcast %cst_21 : f32 to vector<8x1xf32>
      %37 = arith.addf %35, %36 : vector<8x1xf32>
      %38 = tpu.reciprocal %37 : vector<8x1xf32> -> vector<8x1xf32>
      %39 = vector.broadcast %38 : vector<8x1xf32> to vector<8x8xf32>
      %40 = arith.mulf %18, %39 : vector<8x8xf32>
      %c0_22 = arith.constant 0 : index
      %c0_23 = arith.constant 0 : index
      %41 = vector.load %arg8[%c0_22, %c0_23] : memref<8x8xf32, #tpu.memory_space<vmem>>, vector<8x8xf32>
      tpu.vector_store %arg8[%c0_22, %c0_23], %40 {strides = array<i32>} : memref<8x8xf32, #tpu.memory_space<vmem>>, vector<8x8xf32>,
      %42 = arith.mulf %19, %19 : vector<8x4xf32>
      %c0_24 = arith.constant 0 : index
      %c0_25 = arith.constant 0 : index
      %43 = vector.load %arg5[%c0_24, %c0_25] : memref<4x4xf32, #tpu.memory_space<vmem>>, vector<4x4xf32>
      %cst_26 = arith.constant dense<0.000000e+00> : vector<8x4xf32>
      %44 = tpu.matmul %42, %43, %cst_26 {dimension_numbers = #tpu.dot_dimension_numbers<[1], [0], [0], [1], [0, 0, 1, 1], [], []>} : vector<8x4xf32>, vector<4x4xf32>, vector<8x4xf32> -> vector<8x4xf32>
      %45 = math.sqrt %44 : vector<8x4xf32>
      %cst_27 = arith.constant 9.99999993E-9 : f32
      %46 = vector.broadcast %cst_27 : f32 to vector<8x4xf32>
      %47 = arith.addf %45, %46 : vector<8x4xf32>
      %48 = tpu.reciprocal %47 : vector<8x4xf32> -> vector<8x4xf32>
      %49 = arith.mulf %19, %48 : vector<8x4xf32>
      %c0_28 = arith.constant 0 : index
      %c0_29 = arith.constant 0 : index
      %50 = vector.load %arg9[%c0_28, %c0_29] : memref<8x8xf32, #tpu.memory_space<vmem>>, vector<8x4xf32>
      tpu.vector_store %arg9[%c0_28, %c0_29], %49 {strides = array<i32>} : memref<8x8xf32, #tpu.memory_space<vmem>>, vector<8x4xf32>,
      %c0_30 = arith.constant 0 : index
      %c4 = arith.constant 4 : index
      %51 = vector.load %arg9[%c0_30, %c4] : memref<8x8xf32, #tpu.memory_space<vmem>>, vector<8x4xf32>
      tpu.vector_store %arg9[%c0_30, %c4], %20 {strides = array<i32>} : memref<8x8xf32, #tpu.memory_space<vmem>>, vector<8x4xf32>,
    } else {
    }
    return
  }
  func.func @transform_0(%arg0: i32, %arg1: i32) -> (i32, i32) {
    %c0_i32 = arith.constant 0 : i32
    return %arg0, %arg1 : i32, i32
  }
  func.func @transform_1(%arg0: i32, %arg1: i32) -> (i32, i32) {
    %c0_i32 = arith.constant 0 : i32
    %c0_i32_0 = arith.constant 0 : i32
    return %arg1, %c0_i32 : i32, i32
  }
  func.func @transform_2(%arg0: i32, %arg1: i32) -> (i32, i32) {
    %c0_i32 = arith.constant 0 : i32
    %c0_i32_0 = arith.constant 0 : i32
    %c0_i32_1 = arith.constant 0 : i32
    return %c0_i32, %c0_i32_0 : i32, i32
  }
  func.func @transform_3(%arg0: i32, %arg1: i32) -> (i32, i32) {
    %c0_i32 = arith.constant 0 : i32
    %c0_i32_0 = arith.constant 0 : i32
    %c0_i32_1 = arith.constant 0 : i32
    return %c0_i32, %c0_i32_0 : i32, i32
  }
  func.func @transform_4(%arg0: i32, %arg1: i32) -> (i32, i32) {
    %c0_i32 = arith.constant 0 : i32
    %c0_i32_0 = arith.constant 0 : i32
    return %arg0, %c0_i32 : i32, i32
  }
  func.func @transform_5(%arg0: i32, %arg1: i32) -> (i32, i32) {
    %c0_i32 = arith.constant 0 : i32
    %c0_i32_0 = arith.constant 0 : i32
    return %arg0, %c0_i32 : i32, i32
  }
  func.func @transform_6(%arg0: i32, %arg1: i32) -> (i32, i32) {
    %c0_i32 = arith.constant 0 : i32
    %c0_i32_0 = arith.constant 0 : i32
    return %arg0, %c0_i32 : i32, i32
  }
  func.func @transform_7(%arg0: i32, %arg1: i32) -> (i32, i32) {
    %c0_i32 = arith.constant 0 : i32
    %c0_i32_0 = arith.constant 0 : i32
    return %arg0, %c0_i32 : i32, i32
  }
}

</mosaic_0001>

<bundles_post_ra>
// kernel: hybrid_head_forward.1
= control target key start
LH: loop header
LB: loop body
LE: loop exit
PB: predicated region body
PF: predicated region fallthrough
CT: control target
= control target key end

     0   :  { %13 = vsyncpa [#allocation4], 0  ;;  %s1295_s0 = inlined_call_operand.hbm [shape: f32[16,32], index: 0, kind: input, shape index: {}]   ;;  %s1296_s1 = inlined_call_operand.hbm [shape: f32[32,32], index: 1, kind: input, shape index: {}]   ;;  %s1297_s2 = inlined_call_operand.vmem [shape: f32[1,32], index: 2, kind: input, shape index: {}]   ;;  %s1298_s3 = inlined_call_operand.vmem [shape: f32[4,4], index: 3, kind: input, shape index: {}]   ;;  %s1299_s4 = inlined_call_operand.vmem [shape: f32[16,8], index: 4, kind: output, shape index: {0}]   ;;  %s1300_s5 = inlined_call_operand.vmem [shape: f32[16,8], index: 5, kind: output, shape index: {1}]   ;;  %s1301_s6 = inlined_call_operand.vmem [shape: f32[16,8], index: 6, kind: output, shape index: {2}]   ;;  %s1302_s7 = inlined_call_operand.vmem [shape: f32[16,8], index: 7, kind: output, shape index: {3}]  }
   0x1   :  { %15 = vsyncpa [#allocation4 + $0x1], 0 }
   0x2   :  { %16 = vsyncpa [#allocation6], 0  ;;  %s1095_s24 = smov 0   ;;  %s1097_s25 = smov 0  }
   0x3   :  { %s1099_s26 = smov 0   ;;  %s1101_s27 = smov 0  }
   0x4   :  { %s1103_s28 = smov 0   ;;  %s1105_s29 = smov 0  }
   0x5 LB: > { %s794_s30 = sadd.s32 4294967295, %s1042_s29   ;;  %p56_p0 = scmp.ne.s32.totalorder %s1026_s25, %s1022_s24  ;;  %s1042_s29 = sphi %s1105_s29, %s22_s29   ;;  %s1038_s28 = sphi %s1103_s28, %s1319_s28   ;;  %s1034_s27 = sphi %s1101_s27, %s1318_s27   ;;  %s1030_s26 = sphi %s1099_s26, %s1317_s26   ;;  %s1026_s25 = sphi %s1097_s25, %s1316_s25   ;;  %s1022_s24 = sphi %s1095_s24, %s1315_s24  }
   0x6   : > { %p1125_p1 = scmp.eq.s32.totalorder %s794_s30, 0  ;;  %p796_p2 = scmp.ge.s32.totalorder %s1042_s29, 1 }
   0x7   : > { %p239_p3 = scmp.lt.s32.totalorder %s1042_s29, 3  ;;  %s1044_s11 = smov [#allocation5]  }
   0x8   : > { %s1307_s8 = scalar_select %p1125_p1, 1, 0 }
   0x9   : > { %p1133_p4 = por %p1125_p1, %p56_p0  ;;  %p1137_p5 = pnand %p796_p2, %p239_p3 }
   0xa   : > { %s254_s12 = sshll.u32 %s1044_s11, 4  ;;  %s34_s14 = sadd.s32 1, %s1038_s28  ;;  %s255_s12 = int_to_ptr.vmem [resolvable:$true] %s254_s12 }
   0xb   : > { %s1308_s9 = scalar_select %p1133_p4, 1, 0 }
   0xc   : > { %s1309_s10 = scalar_select %p1137_p5, 1, 0 }
   0xd   : > { %p849_p6 = pneg %p1137_p5  ;;  %s930_s17 = scalar_lea.hbm %s1296_s1, 512 }
   0xe   : > { %p931_p8 = scmp.ne.s32.totalorder %s1296_s1, %s930_s17  ;;  %p937_p12 = scmp.lt.u32.totalorder %s930_s17, %s1296_s1 }
   0xf   : > { %p1145_p7 = pnand %p849_p6, %p1125_p1 }
  0x11   : > { %p932_p9 = pneg %p1145_p7 }
  0x13   : > { %p933_p10 = pnand %p932_p9, %p931_p8 }
  0x15   : > { %p934_p11 = pneg %p933_p10 }
  0x17   : > { %p939_p13 = pnand %p937_p12, %p934_p11 }
  0x19   : > { %942 = shalt.err (!%p939_p13)
}
  0x1a   : > { %s943_s22 = scalar_lea.vmem %s255_s12, 512  ;;  %p951_p6 = scmp.lt.s32.totalorder %s255_s12, %s255_s12 }
  0x1b   : > { %p944_p0 = scmp.ne.s32.totalorder %s255_s12, %s943_s22  ;;  %p952_p1 = scmp.lt.s32.totalorder %s943_s22, %s943_s22 }
  0x1d   : > { %p946_p2 = pnand %p944_p0, %p932_p9  ;;  %p953_p4 = por %p952_p1, %p951_p6 }
  0x1f   : > { %p947_p3 = pneg %p946_p2 }
  0x21   : > { %p954_p5 = pnand %p953_p4, %p947_p3 }
  0x23   : > { %957 = shalt.err (!%p954_p5)
}
  0x24   : > { %s1045_s23 = smov 128   ;;  %s1046_s24 = smov 8  }
  0x25   : > { %852 = dma.hbm_to_vmem [thread:$0]  (!%p1145_p7), %s1296_s1, 512, %s255_s12, [#allocation6], %s1045_s23, %s1045_s23, %s1046_s24  }
  0x26   : > { %p36_p1 = scmp.ge.s32.totalorder %s34_s14, 2  ;;  %s43_s15 = sadd.s32 1, %s1030_s26 }
  0x27   : > { %p50_p4 = scmp.ne.s32.totalorder %s1030_s26, %s1026_s25  ;;  %p51_p5 = scmp.eq.s32.totalorder %s1042_s29, 0 }
  0x28   : > { %s1321_s14 = smov (%p36_p1, %s34_s14), 0  ;;  %p858_p9 = scmp.lt.s32.totalorder %s1042_s29, 2 }
  0x29   : > { %p52_p8 = por %p51_p5, %p50_p4  ;;  %s38_s16 = ssub.s32 %s1038_s28, %s1321_s14 }
  0x2a   : > { %s274_s17 = sand.u32 1, %s1030_s26   ;;  %p41_p10 = scmp.eq.s32.totalorder %s38_s16, 0 }
  0x2b   : > { %s799_s18 = sshll.u32 %s274_s17, 3  ;;  %s800_s19 = sshll.u32 %s1038_s28, 7 }
  0x2c   : > { %s1178_s20 = scalar_select %p41_p10, %s1030_s26, %s43_s15  }
  0x2d   : > { %s1183_s12 = scalar_lea.hbm %s1295_s0, %s800_s19  ;;  %s278_s22 = scalar_lea.vmem [#allocation3], %s799_s18 }
  0x2e   : > { %s286_s23 = sshll.u32 %s278_s22, 4  ;;  %p1185_p7 = pnand %p858_p9, %p52_p8  ;;  %s1189_s23 = int_to_ptr.vmem [resolvable:$true] %s286_s23 }
  0x2f   : > { %s275_s30 = scalar_lea.sflag [#allocation4], %s274_s17  ;;  %s958_s11 = scalar_lea.hbm %s1183_s12, 128 }
  0x30   : > { %p959_p11 = scmp.ne.s32.totalorder %s1183_s12, %s958_s11  ;;  %p960_p12 = pneg %p1185_p7 }
  0x31   : > { %s963_s18 = scalar_lea.hbm %s1295_s0, 256  ;;  %p964_p2 = scmp.lt.u32.totalorder %s1183_s12, %s1295_s0 }
  0x32   : > { %p961_p13 = pnand %p960_p12, %p959_p11  ;;  %p965_p3 = scmp.lt.u32.totalorder %s963_s18, %s958_s11 }
  0x33   : > { %p967_p1 = scmp.lt.u32.totalorder %s958_s11, %s1183_s12 }
  0x34   : > { %p962_p0 = pneg %p961_p13  ;;  %p966_p6 = por %p965_p3, %p964_p2 }
  0x36   : > { %p968_p4 = por %p967_p1, %p966_p6 }
  0x38   : > { %p969_p5 = pnand %p968_p4, %p962_p0 }
  0x3a   : > { %972 = shalt.err (!%p969_p5)
}
  0x3b   : > { %s973_s17 = scalar_lea.vmem %s1189_s23, 128  ;;  %s1047_s21 = smov [#allocation3]  }
  0x3c   : > { %p974_p8 = scmp.ne.s32.totalorder %s1189_s23, %s973_s17  ;;  %s978_s22 = sshll.u32 %s1047_s21, 4  ;;  %s979_s22 = int_to_ptr.vmem [resolvable:$false] %s978_s22 }
  0x3d   : > { %s980_s15 = scalar_lea.vmem %s979_s22, 256  ;;  %p981_p11 = scmp.lt.s32.totalorder %s1189_s23, %s979_s22 }
  0x3e   : > { %p976_p9 = pnand %p974_p8, %p960_p12  ;;  %p982_p13 = scmp.lt.s32.totalorder %s980_s15, %s973_s17 }
  0x40   : > { %p977_p10 = pneg %p976_p9  ;;  %p983_p2 = por %p982_p13, %p981_p11 }
  0x42   : > { %p984_p3 = pnand %p983_p2, %p977_p10 }
  0x44   : > { %987 = shalt.err (!%p984_p3)
}
  0x45   : > { %856 = dma.hbm_to_vmem [thread:$0]  (!%p1185_p7), %s1183_s12, 128, %s1189_s23, %s275_s30  }
  0x46   : > { %p1312_p0 = scmp.ne.s32.totalorder %s1309_s10, 0 }
  0x47   : > { %s297_s11 = sand.u32 (!%p1312_p0), 1, %s1026_s25   ;;  %p1313_p12 = scmp.ne.s32.totalorder (!%p1312_p0), %s1308_s9, 0 }
  0x48   : > { %295 = sbr.rel (%p1312_p0) target bundleno = 912 (0x390), region = 36  ;;  %s802_s16 = sshll.u32 (!%p1312_p0), %s297_s11, 3 }
  0x49   : > { %s298_s18 = scalar_lea.sflag (!%p1312_p0), [#allocation4], %s297_s11  ;;  %s301_s19 = scalar_lea.vmem (!%p1312_p0), [#allocation3], %s802_s16 }
  0x4f   : > { %1013 = dma.done.wait (%p1313_p12), %s298_s18, 128  }
  0x50   : > { %1015 = vsyncadd (%p1313_p12), %s298_s18, 4294967168  ;;  %p1314_p6 = scmp.ne.s32.totalorder %s1307_s8, 0 }
  0x52   : > { %1017 = dma.done.wait (%p1314_p6), [#allocation6], 512  }
  0x53   : > { %1019 = vsyncadd (%p1314_p6), [#allocation6], 4294966784  ;;  %vm368_vm0 = vcmask 261120   ;;  %v1048_v0 = vmov 0.0|0.0   ;;  %vm1049_vm1 = vmmov 0   ;;  %v1050_v1 = vmov 0.0  }
  0x54   : > { %837 = vmatprep.subr.bf16.mxu0 %v1048_v0  ;;  %829 = vmatprep.mubr.msk.f32.mxu0 %vm1049_vm1, %v1050_v1  ;;  %369 = vst.msk [vmem:[#allocation2] sm:$0xff] %vm368_vm0, %v1050_v1  ;;  %v372_v2 = vld [vmem:[#allocation5] sm:$0xff]  ;;  %v373_v3 = vld [vmem:[#allocation5 + $0x8] sm:$0xff]  ;;  %v374_v4 = vld [vmem:[#allocation5 + $0x10] sm:$0xff]  ;;  %vm516_vm2 = vcmask 1043456   ;;  %p348_p7 = scmp.lt.s32.totalorder %s1034_s27, 1 }
  0x55   : > { %832 = vmatprep.subr.mxu1 %v1050_v1  ;;  %834 = vmatprep.mubr.msk.f32.mxu1 %vm1049_vm1, %v1050_v1  ;;  %v838_v5 = vpack.c.bf16 %v373_v3, %v372_v2  ;;  %v375_v6 = vld [vmem:[#allocation5 + $0x18] sm:$0xff]  ;;  %v510_v9 = vld [vmem:[%s1298_s3] sm:$0xf]  ;;  %vm464_vm3 = vcmask 64512   ;;  %s1052_s17 = smov 104   ;;  %s1053_s21 = smov 120  }
  0x56   : > { %v841_v7 = vpack.c.bf16 %v375_v6, %v374_v4  ;;  %v371_v8 = vld [vmem:[%s301_s19] sm:$0xff]  ;;  %833 = vmatpush3.msk.msra.mxu1 %vm516_vm2, %v510_v9  ;;  %s1323_s27 = smov (!%p348_p7, %s1034_s27), 1  ;;  %v809_v14 = vld [vmem:[%s1297_s2] ss:$0 sm:$0xff]  ;;  %vm513_vm4 = vcmask 31744   ;;  %s1054_s22 = smov 24  }
  0x57   : > { %839 = vmatpush3.bf16.msra.mxu0 %v838_v5  ;;  %s1235_s10 = sshll.u32 %s1323_s27, 3  ;;  %s1051_s27 = smov 112   ;;  %vm613_vm11 = vcmask 64544  }
  0x58   : > { %840 = vmatprep.subr.bf16.mxu0 %v1048_v0  ;;  %s351_s13 = scalar_lea.vmem %s1299_s4, %s1235_s10  ;;  %s355_s16 = scalar_lea.vmem %s1300_s5, %s1235_s10 }
  0x59   : > { %s359_s8 = scalar_lea.vmem %s1301_s6, %s1235_s10  ;;  %s363_s23 = scalar_lea.vmem %s1302_s7, %s1235_s10 }
  0x5b   : > { %842 = vmatpush3.bf16.msra.mxu0 %v841_v7  ;;  %v370_v10 = vld [vmem:[#allocation2] sm:$0xff] }
  0x5e   : > { %830 = vmatmul.mubr.msk.f32.vlgmr.msra.gmra.mrb[0].mxu0 %vm368_vm0, %v371_v8 }
 0x131   : > { %v446_v11 = vpop.f32.mrb[0].mxu0 }
 0x132   : > { %v450_v12 = vadd.f32 %v446_v11, %v370_v10  ;;  %v831_v13 = vpop.f32.mrb[1].mxu0 }
 0x134   : > { %451 = vst.msk [vmem:[#allocation2] sm:$0xff] %vm368_vm0, %v450_v12 }
 0x13b   : > { %v455_v15 = vld [vmem:[#allocation2] sm:$0xff] }
 0x13c   : > { %v1244_v16 = vadd.f32 %v809_v14, %v455_v15 }
 0x13e   : > { %v466_v17 = vmul.f32 %v1244_v16, %v1244_v16  ;;  %465 = vst.msk [vmem:[%s351_s13] sm:$0xff] %vm464_vm3, %v1244_v16 }
 0x140   : > { %489 = vrot.lane.b32.xlu1 %v466_v17, %s1051_s27  ;;  %511 = vrot.lane.b32.xlu0 %v466_v17, %s1052_s17 }
 0x144   : > { %468 = vrot.lane.b32.xlu0 %v466_v17, %s1053_s21 }
 0x1b2   : > { %v490_v18 = vpop.permute.xlu1 %489  ;;  %v512_v19 = vpop.permute.xlu0 %511 }
 0x1b3   : > { %835 = vmatmul.mubr.msk.f32.vlgmr.msra.gmra.mrb[0].mxu1 %vm513_vm4, %v512_v19  ;;  %v492_v20 = vsel %vm464_vm3, %v490_v18, 0.0 }
 0x1b4   : > { %493 = vadd.xlane.f32.xlu0 %v492_v20 }
 0x1b6   : > { %v469_v21 = vpop.permute.xlu0 %468 }
 0x1b7   : > { %v471_v22 = vsel %vm464_vm3, %v469_v21, 0.0 }
 0x1b8   : > { %472 = vadd.xlane.f32.xlu1 %v471_v22 }
 0x241   : > { %v494_v32 = vpop.xlane.xlu0 %493 }
 0x242   : > { %vm497_vm7 = vcmp.eq.f32.partialorder %v494_v32, inf  ;;  %v500_v38 = vand.u32 2147483648, %v494_v32  ;;  %vm499_vm8 = vcmp.eq.f32.partialorder %v494_v32, 0.0 }
 0x245   : > { %v473_v23 = vpop.xlane.xlu1 %472 }
 0x246   : > { %918 = vrsqrt.f32 %v473_v23  ;;  %vm476_vm5 = vcmp.eq.f32.partialorder %v473_v23, inf  ;;  %v479_v26 = vand.u32 2147483648, %v473_v23  ;;  %vm478_vm6 = vcmp.eq.f32.partialorder %v473_v23, 0.0 }
 0x250   : > { %v919_v24 = vpop.eup %918 }
 0x251   : > { %v475_v25 = vmul.f32 %v919_v24, %v473_v23 }
 0x253   : > { %v477_v27 = vsel %vm476_vm5, %v473_v23, %v475_v25 }
 0x254   : > { %v480_v28 = vsel %vm478_vm6, %v479_v26, %v477_v27 }
 0x255   : > { %v481_v29 = vadd.f32 1.0, %v480_v28 }
 0x257   : > { %920 = vrcp.f32 %v481_v29 }
 0x258   : > { %922 = vrsqrt.f32 %v494_v32 }
 0x261   : > { %v921_v30 = vpop.eup %920 }
 0x262   : > { %v483_v31 = vmul.f32 %v921_v30, %v1244_v16  ;;  %v923_v33 = vpop.eup %922 }
 0x263   : > { %v496_v36 = vmul.f32 %v923_v33, %v494_v32 }
 0x264   : > { %485 = vrot.lane.b32.xlu1 %v483_v31, %s1053_s21 }
 0x265   : > { %v498_v37 = vsel %vm497_vm7, %v494_v32, %v496_v36 }
 0x266   : > { %v501_v39 = vsel %vm499_vm8, %v500_v38, %v498_v37 }
 0x267   : > { %v502_v42 = vadd.f32 1e-08, %v501_v39 }
 0x286   : > { %v586_v34 = vpop.f32.mrb[0].mxu1 }
 0x287   : > { %924 = vrsqrt.f32 %v586_v34  ;;  %v836_v35 = vpop.f32.mrb[1].mxu1  ;;  %vm592_vm9 = vcmp.eq.f32.partialorder %v586_v34, inf  ;;  %v595_v43 = vand.u32 2147483648, %v586_v34  ;;  %vm594_vm10 = vcmp.eq.f32.partialorder %v586_v34, 0.0 }
 0x288   : > { %926 = vrcp.f32 %v502_v42 }
 0x291   : > { %v925_v40 = vpop.eup %924 }
 0x292   : > { %v591_v41 = vmul.f32 %v925_v40, %v586_v34  ;;  %v927_v47 = vpop.eup %926 }
 0x293   : > { %v504_v49 = vmul.f32 %v927_v47, %v1244_v16 }
 0x294   : > { %v593_v44 = vsel %vm592_vm9, %v586_v34, %v591_v41 }
 0x295   : > { %v596_v45 = vsel %vm594_vm10, %v595_v43, %v593_v44 }
 0x296   : > { %v597_v46 = vadd.f32 1e-08, %v596_v45 }
 0x298   : > { %928 = vrcp.f32 %v597_v46 }
 0x2a2   : > { %v929_v48 = vpop.eup %928 }
 0x2a3   : > { %600 = vrot.lane.b32.xlu0 %v929_v48, %s1054_s22 }
 0x2a7   : > { %506 = vrot.lane.b32.xlu0 %v504_v49, %s1051_s27 }
 0x2d6   : > { %v486_v50 = vpop.permute.xlu1 %485 }
 0x2d7   : > { %488 = vst.msk [vmem:[%s355_s16] sm:$0xff] %vm464_vm3, %v486_v50 }
 0x315   : > { %v601_v51 = vpop.permute.xlu0 %600 }
 0x316   : > { %v603_v52 = vmul.f32 %v601_v51, %v1244_v16 }
 0x318   : > { %605 = vrot.lane.b32.xlu1 %v603_v52, %s1052_s17 }
 0x319   : > { %v507_v53 = vpop.permute.xlu0 %506 }
 0x31a   : > { %509 = vst.msk [vmem:[%s359_s8] sm:$0xff] %vm464_vm3, %v507_v53 }
 0x31c   : > { %610 = vrot.lane.b32.xlu1 %v1244_v16, %s1052_s17 }
 0x38a   : > { %v606_v54 = vpop.permute.xlu1 %605 }
 0x38b   : > { %608 = vst.msk [vmem:[%s363_s23] sm:$0xff] %vm513_vm4, %v606_v54 }
 0x38e   : > { %v611_v55 = vpop.permute.xlu1 %610 }
 0x38f   : > { %614 = vst.msk [vmem:[%s363_s23] sm:$0xff] %vm613_vm11, %v611_v55 }
 0x390 PF: > { %s22_s29 = sadd.s32 1, %s1042_s29   ;;  %s1315_s24 = smov %s1026_s25 }
 0x391   : > { %p19_p1 = scmp.ge.s32.totalorder %s22_s29, 4   ;;  %s1316_s25 = smov %s1030_s26 }
 0x392   : > { %s1317_s26 = smov %s1178_s20  ;;  %s1318_s27 = smov %s1038_s28 }
 0x393   : > { %s1319_s28 = smov %s1321_s14  ;;  %21 = sbr.rel (!%p19_p1) target bundleno = 5 (0x5), region = 125 }
 0x39a   :  { %676 = vsyncpa [#allocation4], 1 }
 0x39b   :  { %678 = vsyncpa [#allocation4 + $0x1], 1 }
 0x39c   :  { %679 = vsyncpa [#allocation6], 1 }

</bundles_post_ra>
